<compile_context>
chip_gen: v7x
topology: tpu7x:2x2x1
jax: 0.10.0
libtpu: 0.0.40
codegen_flags: <defaults>
</compile_context>

<pallas_src>
import functools

import numpy as np
import jax
import jax.numpy as jnp
from jax.experimental import pallas as pl
from jax.experimental.pallas import tpu as pltpu


# ----------------------------------------------------------------------------
# DFT / iDFT matrices (deterministic "parameter" setup on the host)
# ----------------------------------------------------------------------------
def _fwd_dft(L, M):
    """Truncated real rfft bases, (M, L): X_re = cq @ x, X_im = sq @ x."""
    f = np.arange(M)[:, None]                     # (M, 1) frequency index
    n = np.arange(L)[None, :]                     # (1, L) time index
    ang = 2.0 * np.pi * f * n / L                 # (M, L)
    cq = np.cos(ang).astype(np.float32)
    sq = (-np.sin(ang)).astype(np.float32)
    return cq, sq


def _inv_dft(L, M, scale):
    """Truncated irfft bases, (L, M): x = ict @ X_re + ist @ X_im.
    Imag of the DC bin is ignored (matches torch.fft.irfft c2r semantics); the
    1/(in_channels*out_channels) scale is folded in."""
    f = np.arange(M)[None, :]                     # (1, M)
    t = np.arange(L)[:, None]                     # (L, 1)
    ang = 2.0 * np.pi * f * t / L                 # (L, M)
    w = np.where((f == 0) | ((L % 2 == 0) & (f == L // 2)), 1.0, 2.0)
    ict = (w * np.cos(ang) / L * scale).astype(np.float32)
    ist = (-w * np.sin(ang) / L * scale).astype(np.float32)
    return ict, ist


def _vmem_capacity_bytes():
    try:
        return int(pltpu.get_tpu_info().vmem_capacity_bytes)
    except Exception:
        return 64 << 20     # conservative fallback: v7x per-TensorCore VMEM


def _pick_batch_group(B, Lq, Lkv, EH, H, Mq, Mkv,
                      q_bytes, k_bytes, out_bytes, budget):
    """Largest divisor GB of B whose double-buffered q/k/out blocks plus the
    in-kernel f32 temporaries fit `budget`, keeping the unrolled in-kernel batch
    loop short and (for v7x's two TensorCores) >= 2 grid steps when B >= 2."""
    # double-buffered HBM<->VMEM blocks per batch element
    blk = 2 * EH * (Lq * q_bytes + Lkv * k_bytes + Lq * out_bytes)
    # f32 in-kernel temporaries per batch element (spectra, head-masked K, A/t, R, out)
    tmp = 4 * (EH * (2 * Lq + Lkv + 4 * Mq + 2 * Mkv + 2 * H * Mkv)
               + 4 * Mq * H * Mkv)
    # resident constants (double-buffered), independent of GB
    const = 2 * 4 * (2 * Mq * Lq + 2 * Mkv * Lkv + 2 * Lq * Mq)
    per_b = blk + tmp
    budget = max(budget - const, per_b)
    gb = 1
    for cand in range(1, B + 1):
        if B % cand:
            continue
        if cand > 8:                       # cap the unrolled in-kernel loop length
            break
        if cand * per_b > budget:
            break
        if B >= 2 and B // cand < 2:       # keep >= 2 grid steps for v7x's 2 TCs
            break
        gb = cand
    return gb


def _dot_nt(a, b):
    """a (M, C) x b (N, C) -> (M, N), contracting the lane (last) dims (q @ k.T)."""
    return jax.lax.dot_general(a, b, (((1,), (1,)), ((), ())),
                               preferred_element_type=jnp.float32)


# ----------------------------------------------------------------------------
# Pallas kernel: GB batch elements (all heads) per grid step
# ----------------------------------------------------------------------------
def _spectral_cross_kernel(q_ref, k_ref, cq_ref, sq_ref, ck_ref, sk_ref,
                           ict_ref, ist_ref, o_ref, *, heads, mkv, activation):
    f32 = jnp.float32
    gb = q_ref.shape[0]
    eh = q_ref.shape[-1]

    cq = cq_ref[...]          # (Mq,  Lq)
    sq = sq_ref[...]
    ck = ck_ref[...]          # (Mkv, Lkv)
    sk = sk_ref[...]
    ict = ict_ref[...]        # (Lq, Mq)
    ist = ist_ref[...]

    # lane index -> head id: native (..., E, H) layout flattened, so h is minor.
    col_head = jax.lax.broadcasted_iota(jnp.int32, (1, eh), 1) % heads
    head_masks = [(col_head == h).astype(f32) for h in range(heads)]   # hoisted

    for g in range(gb):                       # short, wrapper-capped unrolled loop
        xq = q_ref[g].astype(f32)             # (Lq,  E*H)
        xk = k_ref[g].astype(f32)             # (Lkv, E*H)

        # --- truncated rfft as MXU matmuls; N (lane) dim = E*H (orientation flip).
        q_re = jnp.dot(cq, xq, preferred_element_type=f32)    # (Mq,  E*H)
        q_im = jnp.dot(sq, xq, preferred_element_type=f32)
        k_re = jnp.dot(ck, xk, preferred_element_type=f32)    # (Mkv, E*H)
        k_im = jnp.dot(sk, xk, preferred_element_type=f32)

        # --- head-masked K spectra stacked along SUBLANES: (H*Mkv, E*H).
        # Rows [h*Mkv:(h+1)*Mkv] keep only head h's (e, h) lanes.
        k_re_h = jnp.concatenate([k_re * m for m in head_masks], axis=0)
        k_im_h = jnp.concatenate([k_im * m for m in head_masks], axis=0)

        # --- cross spectrum for all heads at once:
        # a[m, h*Mkv+n] = sum_e Qft[m,(e,h)] * Kft[n,(e,h)]   (complex, no conj).
        a_re = _dot_nt(q_re, k_re_h) - _dot_nt(q_im, k_im_h)   # (Mq, H*Mkv)
        a_im = _dot_nt(q_re, k_im_h) + _dot_nt(q_im, k_re_h)

        if activation == 'tanh':
            # tanh(a+ib) = (sinh 2a + i sin 2b) / (cosh 2a + cos 2b); one exp + one
            # approx reciprocal feeds cosh/sinh (EUP); clamp keeps exp inside f32.
            two_a = jnp.clip(2.0 * a_re, -30.0, 30.0)
            two_b = 2.0 * a_im
            ea = jnp.exp(two_a)
            inv_ea = pl.reciprocal(ea, approx=True)
            denom = 0.5 * (ea + inv_ea) + jnp.cos(two_b)
            inv_d = 1.0 / denom            # exact: denom -> 0 near the poles of tanh
            t_re = 0.5 * (ea - inv_ea) * inv_d
            t_im = jnp.sin(two_b) * inv_d
        elif activation == 'softmax':
            mag = jnp.sqrt(a_re * a_re + a_im * a_im)
            # softmax over the kv-mode axis, per head.
            # TODO(synk): per-head lane slices (sub-128 offsets) -- acceptable for the
            # rarely-used softmax path; the tanh path has no lane slicing.
            t_re = jnp.concatenate(
                [jax.nn.softmax(mag[:, h * mkv:(h + 1) * mkv], axis=-1)
                 for h in range(heads)], axis=-1)
            t_im = None
        else:
            raise ValueError(f'{activation} activation function is not implemented')

        # --- apply spectrum back onto K, all heads at once.  Because k_*_h is
        # head-masked, the plain matmul equals the per-head 'bhxy,bhey->bhex' einsum.
        if t_im is None:
            r_re = jnp.dot(t_re, k_re_h, preferred_element_type=f32)    # (Mq, E*H)
            r_im = jnp.dot(t_re, k_im_h, preferred_element_type=f32)
        else:
            r_re = (jnp.dot(t_re, k_re_h, preferred_element_type=f32)
                    - jnp.dot(t_im, k_im_h, preferred_element_type=f32))
            r_im = (jnp.dot(t_re, k_im_h, preferred_element_type=f32)
                    + jnp.dot(t_im, k_re_h, preferred_element_type=f32))

        # --- truncated irfft (weights, 1/L and 1/(in*out) folded into ict/ist).
        out = (jnp.dot(ict, r_re, preferred_element_type=f32)
               + jnp.dot(ist, r_im, preferred_element_type=f32))        # (Lq, E*H)
        o_ref[g] = out.astype(o_ref.dtype)      # bf16 writeback in native layout


# ----------------------------------------------------------------------------
# Wrapper (free reshapes only, packed constants, pallas_call)
# ----------------------------------------------------------------------------
@functools.partial(jax.jit, static_argnames=('in_channels', 'out_channels',
                                             'modes1', 'activation', 'out_dtype'))
def spectral_cross_1d(q, k, v, mask, *, in_channels, out_channels,
                      modes1=16, activation='tanh', out_dtype=jnp.bfloat16):
    """q: (B, Lq, E, H); k, v: (B, Lkv, E, H); mask unused. Returns (out, None).
    out is (B, Lq, E, H) in out_dtype (bf16 by default, per perf review)."""
    del mask
    assert activation in ('tanh', 'softmax')
    assert modes1 > 0, "only the contiguous-mode path of the torch forward is implemented"
    B, Lq, E, H = q.shape
    Lkv = k.shape[1]
    # torch uses v's length for the kv-mode count but FFTs k; keep that convention
    # and require the two lengths to agree so it is well-defined.
    assert k.shape[1] == v.shape[1], "kernel assumes len(k) == len(v)"
    Mq = min(Lq // 2, modes1)
    Mkv = min(v.shape[1] // 2, modes1)
    EH = E * H

    # Free reshapes only (no transpose, no extra HBM pass): merge trailing (E, H).
    xq = q.reshape(B, Lq, EH)
    xk = k.reshape(B, Lkv, EH)

    cq, sq = _fwd_dft(Lq, Mq)
    ck, sk = _fwd_dft(Lkv, Mkv)
    ict, ist = _inv_dft(Lq, Mq, 1.0 / (in_channels * out_channels))
    consts = [jnp.asarray(a) for a in (cq, sq, ck, sk, ict, ist)]

    cap = _vmem_capacity_bytes()
    GB = _pick_batch_group(
        B, Lq, Lkv, EH, H, Mq, Mkv,
        q.dtype.itemsize, k.dtype.itemsize, jnp.dtype(out_dtype).itemsize,
        budget=(cap * 3) // 8)
    vmem_limit = int(min((cap * 3) // 4, 96 << 20))

    kernel = functools.partial(_spectral_cross_kernel,
                               heads=H, mkv=Mkv, activation=activation)

    def _const_spec(shape):
        return pl.BlockSpec(shape, lambda i: (0, 0))

    # NOTE: output lane dim is E*H; lane-dense (>=128) for realistic configs.
    # TODO(synk): for tiny E*H (<128) a flattened (B, Lq*E*H) out layout would avoid
    # masked vst stores, at the cost of an in-kernel sublane->lane relayout.
    out = pl.pallas_call(
        kernel,
        out_shape=jax.ShapeDtypeStruct((B, Lq, EH), out_dtype),
        grid_spec=pltpu.PrefetchScalarGridSpec(
            num_scalar_prefetch=0,
            grid=(B // GB,),
            in_specs=[
                pl.BlockSpec((GB, Lq, EH), lambda i: (i, 0, 0)),
                pl.BlockSpec((GB, Lkv, EH), lambda i: (i, 0, 0)),
                _const_spec((Mq, Lq)), _const_spec((Mq, Lq)),
                _const_spec((Mkv, Lkv)), _const_spec((Mkv, Lkv)),
                _const_spec((Lq, Mq)), _const_spec((Lq, Mq)),
            ],
            out_specs=pl.BlockSpec((GB, Lq, EH), lambda i: (i, 0, 0)),
        ),
        compiler_params=pltpu.CompilerParams(
            dimension_semantics=('parallel',),   # independent batch groups -> 2 TCs
            vmem_limit_bytes=vmem_limit,
        ),
    )(xq, xk, *consts)

    return out.reshape(B, Lq, E, H), None


# ----------------------------------------------------------------------------
# Pure-JAX reference (jnp.fft) for correctness check
# ----------------------------------------------------------------------------
def _reference(q, k, in_channels, out_channels, modes1=16, activation='tanh'):
    B, Lq, E, H = q.shape
    Lkv = k.shape[1]
    Mq = min(Lq // 2, modes1)
    Mkv = min(Lkv // 2, modes1)
    xq = jnp.transpose(q, (0, 3, 2, 1))
    xk = jnp.transpose(k, (0, 3, 2, 1))
    xq_ft_ = jnp.fft.rfft(xq, axis=-1)[..., :Mq]
    xk_ft_ = jnp.fft.rfft(xk, axis=-1)[..., :Mkv]
    xqk_ft = jnp.einsum('bhex,bhey->bhxy', xq_ft_, xk_ft_)
    if activation == 'tanh':
        xqk_ft = jnp.tanh(xqk_ft)
    else:
        xqk_ft = jax.nn.softmax(jnp.abs(xqk_ft), axis=-1).astype(jnp.complex64)
    xqkv_ft = jnp.einsum('bhxy,bhey->bhex', xqk_ft, xk_ft_)
    out_ft = jnp.zeros((B, H, E, Lq // 2 + 1), dtype=jnp.complex64)
    out_ft = out_ft.at[..., :Mq].set(xqkv_ft)
    out = jnp.fft.irfft(out_ft / in_channels / out_channels, n=Lq, axis=-1)
    return jnp.transpose(out, (0, 3, 2, 1))


if __name__ == '__main__':
    B, L, E, H = 2, 16, 8, 4          # q/k/v: (B, L, E, H)
    in_channels, out_channels, modes1 = 8, 8, 16

    key = jax.random.PRNGKey(0)
    kq, kk, kv = jax.random.split(key, 3)
    # moderate input scale keeps the complex tanh away from its poles
    q = 0.1 * jax.random.normal(kq, (B, L, E, H), dtype=jnp.float32)
    k = 0.1 * jax.random.normal(kk, (B, L, E, H), dtype=jnp.float32)
    v = 0.1 * jax.random.normal(kv, (B, L, E, H), dtype=jnp.float32)

    for act in ('tanh', 'softmax'):
        out, attn = spectral_cross_1d(
            q, k, v, None,
            in_channels=in_channels, out_channels=out_channels,
            modes1=modes1, activation=act)
        out = jax.block_until_ready(out)
        ref = jax.block_until_ready(
            _reference(q, k, in_channels, out_channels, modes1, act))
        assert out.shape == (B, L, E, H)
        assert attn is None
        np.testing.assert_allclose(np.asarray(out, dtype=np.float32),
                                   np.asarray(ref), rtol=3e-2, atol=2e-3)
    print("KERNEL_OK")
</pallas_src>

<mosaic_0001>
module attributes {stable_mosaic.version = 11 : i64} {
  func.func @_spectral_cross_kernel(%arg0: i32, %arg1: memref<1x16x32xf32, #tpu.memory_space<vmem>>, %arg2: memref<1x16x32xf32, #tpu.memory_space<vmem>>, %arg3: memref<8x16xf32, #tpu.memory_space<vmem>>, %arg4: memref<8x16xf32, #tpu.memory_space<vmem>>, %arg5: memref<8x16xf32, #tpu.memory_space<vmem>>, %arg6: memref<8x16xf32, #tpu.memory_space<vmem>>, %arg7: memref<16x8xf32, #tpu.memory_space<vmem>>, %arg8: memref<16x8xf32, #tpu.memory_space<vmem>>, %arg9: memref<1x16x32xbf16, #tpu.memory_space<vmem>>) attributes {dimension_semantics = [#tpu.dimension_semantics<parallel>], iteration_bounds = array<i64: 2>, scalar_prefetch = 0 : i64, scratch_operands = 0 : i64, tpu.core_type = #tpu.core_type<tc>, window_params = [{transform_indices = @transform_0, window_bounds = array<i64: 1, 16, 32>}, {transform_indices = @transform_1, window_bounds = array<i64: 1, 16, 32>}, {pipeline_mode = #tpu.pipeline_mode<synchronous>, transform_indices = @transform_2, window_bounds = array<i64: 8, 16>}, {pipeline_mode = #tpu.pipeline_mode<synchronous>, transform_indices = @transform_3, window_bounds = array<i64: 8, 16>}, {pipeline_mode = #tpu.pipeline_mode<synchronous>, transform_indices = @transform_4, window_bounds = array<i64: 8, 16>}, {pipeline_mode = #tpu.pipeline_mode<synchronous>, transform_indices = @transform_5, window_bounds = array<i64: 8, 16>}, {pipeline_mode = #tpu.pipeline_mode<synchronous>, transform_indices = @transform_6, window_bounds = array<i64: 16, 8>}, {pipeline_mode = #tpu.pipeline_mode<synchronous>, transform_indices = @transform_7, window_bounds = array<i64: 16, 8>}, {transform_indices = @transform_8, window_bounds = array<i64: 1, 16, 32>}]} {
    %c0 = arith.constant 0 : index
    %c0_0 = arith.constant 0 : index
    %0 = vector.load %arg3[%c0, %c0_0] : memref<8x16xf32, #tpu.memory_space<vmem>>, vector<8x16xf32>
    %c0_1 = arith.constant 0 : index
    %c0_2 = arith.constant 0 : index
    %1 = vector.load %arg4[%c0_1, %c0_2] : memref<8x16xf32, #tpu.memory_space<vmem>>, vector<8x16xf32>
    %c0_3 = arith.constant 0 : index
    %c0_4 = arith.constant 0 : index
    %2 = vector.load %arg5[%c0_3, %c0_4] : memref<8x16xf32, #tpu.memory_space<vmem>>, vector<8x16xf32>
    %c0_5 = arith.constant 0 : index
    %c0_6 = arith.constant 0 : index
    %3 = vector.load %arg6[%c0_5, %c0_6] : memref<8x16xf32, #tpu.memory_space<vmem>>, vector<8x16xf32>
    %c0_7 = arith.constant 0 : index
    %c0_8 = arith.constant 0 : index
    %4 = vector.load %arg7[%c0_7, %c0_8] : memref<16x8xf32, #tpu.memory_space<vmem>>, vector<16x8xf32>
    %c0_9 = arith.constant 0 : index
    %c0_10 = arith.constant 0 : index
    %5 = vector.load %arg8[%c0_9, %c0_10] : memref<16x8xf32, #tpu.memory_space<vmem>>, vector<16x8xf32>
    %6 = tpu.iota {dimensions = array<i32: 1>} : vector<1x32xi32>
    %c4_i32 = arith.constant 4 : i32
    %c0_i32 = arith.constant 0 : i32
    %7 = arith.cmpi eq, %c4_i32, %c0_i32 : i32
    %c1_i32 = arith.constant 1 : i32
    %8 = arith.select %7, %c1_i32, %c4_i32 : i32
    %9 = vector.broadcast %8 : i32 to vector<1x32xi32>
    %10 = arith.remsi %6, %9 : vector<1x32xi32>
    %c0_i32_11 = arith.constant 0 : i32
    %11 = vector.broadcast %c0_i32_11 : i32 to vector<1x32xi32>
    %12 = arith.cmpi ne, %10, %11 : vector<1x32xi32>
    %c0_i32_12 = arith.constant 0 : i32
    %13 = vector.broadcast %c0_i32_12 : i32 to vector<1x32xi32>
    %14 = arith.cmpi slt, %10, %13 : vector<1x32xi32>
    %c0_i32_13 = arith.constant 0 : i32
    %15 = arith.cmpi slt, %8, %c0_i32_13 : i32
    %16 = vector.broadcast %15 : i1 to vector<1x32xi1>
    %17 = vector.broadcast %16 : vector<1x32xi1> to vector<1x32xi1>
    %18 = arith.xori %14, %17 : vector<1x32xi1>
    %19 = arith.andi %18, %12 : vector<1x32xi1>
    %20 = vector.broadcast %8 : i32 to vector<1x32xi32>
    %21 = arith.addi %10, %20 : vector<1x32xi32>
    %22 = arith.select %19, %21, %10 : vector<1x32xi1>, vector<1x32xi32>
    %c0_i32_14 = arith.constant 0 : i32
    %23 = vector.broadcast %c0_i32_14 : i32 to vector<1x32xi32>
    %24 = arith.cmpi eq, %22, %23 : vector<1x32xi32>
    %25 = arith.extui %24 : vector<1x32xi1> to vector<1x32xi32>
    %26 = arith.sitofp %25 : vector<1x32xi32> to vector<1x32xf32>
    %c1_i32_15 = arith.constant 1 : i32
    %27 = vector.broadcast %c1_i32_15 : i32 to vector<1x32xi32>
    %28 = arith.cmpi eq, %22, %27 : vector<1x32xi32>
    %29 = arith.extui %28 : vector<1x32xi1> to vector<1x32xi32>
    %30 = arith.sitofp %29 : vector<1x32xi32> to vector<1x32xf32>
    %c2_i32 = arith.constant 2 : i32
    %31 = vector.broadcast %c2_i32 : i32 to vector<1x32xi32>
    %32 = arith.cmpi eq, %22, %31 : vector<1x32xi32>
    %33 = arith.extui %32 : vector<1x32xi1> to vector<1x32xi32>
    %34 = arith.sitofp %33 : vector<1x32xi32> to vector<1x32xf32>
    %c3_i32 = arith.constant 3 : i32
    %35 = vector.broadcast %c3_i32 : i32 to vector<1x32xi32>
    %36 = arith.cmpi eq, %22, %35 : vector<1x32xi32>
    %37 = arith.extui %36 : vector<1x32xi1> to vector<1x32xi32>
    %38 = arith.sitofp %37 : vector<1x32xi32> to vector<1x32xf32>
    %c0_16 = arith.constant 0 : index
    %c0_17 = arith.constant 0 : index
    %c0_18 = arith.constant 0 : index
    %39 = vector.load %arg1[%c0_16, %c0_17, %c0_18] : memref<1x16x32xf32, #tpu.memory_space<vmem>>, vector<1x16x32xf32>
    %40 = vector.shape_cast %39 : vector<1x16x32xf32> to vector<16x32xf32>
    %c0_19 = arith.constant 0 : index
    %c0_20 = arith.constant 0 : index
    %c0_21 = arith.constant 0 : index
    %41 = vector.load %arg2[%c0_19, %c0_20, %c0_21] : memref<1x16x32xf32, #tpu.memory_space<vmem>>, vector<1x16x32xf32>
    %42 = vector.shape_cast %41 : vector<1x16x32xf32> to vector<16x32xf32>
    %cst = arith.constant dense<0.000000e+00> : vector<8x32xf32>
    %43 = tpu.matmul %0, %40, %cst {dimension_numbers = #tpu.dot_dimension_numbers<[1], [0], [0], [1], [0, 0, 1, 1], [], []>} : vector<8x16xf32>, vector<16x32xf32>, vector<8x32xf32> -> vector<8x32xf32>
    %cst_22 = arith.constant dense<0.000000e+00> : vector<8x32xf32>
    %44 = tpu.matmul %1, %40, %cst_22 {dimension_numbers = #tpu.dot_dimension_numbers<[1], [0], [0], [1], [0, 0, 1, 1], [], []>} : vector<8x16xf32>, vector<16x32xf32>, vector<8x32xf32> -> vector<8x32xf32>
    %cst_23 = arith.constant dense<0.000000e+00> : vector<8x32xf32>
    %45 = tpu.matmul %2, %42, %cst_23 {dimension_numbers = #tpu.dot_dimension_numbers<[1], [0], [0], [1], [0, 0, 1, 1], [], []>} : vector<8x16xf32>, vector<16x32xf32>, vector<8x32xf32> -> vector<8x32xf32>
    %cst_24 = arith.constant dense<0.000000e+00> : vector<8x32xf32>
    %46 = tpu.matmul %3, %42, %cst_24 {dimension_numbers = #tpu.dot_dimension_numbers<[1], [0], [0], [1], [0, 0, 1, 1], [], []>} : vector<8x16xf32>, vector<16x32xf32>, vector<8x32xf32> -> vector<8x32xf32>
    %47 = vector.broadcast %26 : vector<1x32xf32> to vector<8x32xf32>
    %48 = arith.mulf %45, %47 : vector<8x32xf32>
    %49 = vector.broadcast %30 : vector<1x32xf32> to vector<8x32xf32>
    %50 = arith.mulf %45, %49 : vector<8x32xf32>
    %51 = vector.broadcast %34 : vector<1x32xf32> to vector<8x32xf32>
    %52 = arith.mulf %45, %51 : vector<8x32xf32>
    %53 = vector.broadcast %38 : vector<1x32xf32> to vector<8x32xf32>
    %54 = arith.mulf %45, %53 : vector<8x32xf32>
    %55 = tpu.concatenate %48, %50, %52, %54 in 0 : vector<8x32xf32>, vector<8x32xf32>, vector<8x32xf32>, vector<8x32xf32> -> vector<32x32xf32>
    %56 = vector.broadcast %26 : vector<1x32xf32> to vector<8x32xf32>
    %57 = arith.mulf %46, %56 : vector<8x32xf32>
    %58 = vector.broadcast %30 : vector<1x32xf32> to vector<8x32xf32>
    %59 = arith.mulf %46, %58 : vector<8x32xf32>
    %60 = vector.broadcast %34 : vector<1x32xf32> to vector<8x32xf32>
    %61 = arith.mulf %46, %60 : vector<8x32xf32>
    %62 = vector.broadcast %38 : vector<1x32xf32> to vector<8x32xf32>
    %63 = arith.mulf %46, %62 : vector<8x32xf32>
    %64 = tpu.concatenate %57, %59, %61, %63 in 0 : vector<8x32xf32>, vector<8x32xf32>, vector<8x32xf32>, vector<8x32xf32> -> vector<32x32xf32>
    %cst_25 = arith.constant dense<0.000000e+00> : vector<8x32xf32>
    %65 = tpu.matmul %43, %55, %cst_25 {dimension_numbers = #tpu.dot_dimension_numbers<[1], [1], [0], [0], [0, 0, 1, 0], [], []>} : vector<8x32xf32>, vector<32x32xf32>, vector<8x32xf32> -> vector<8x32xf32>
    %cst_26 = arith.constant dense<0.000000e+00> : vector<8x32xf32>
    %66 = tpu.matmul %44, %64, %cst_26 {dimension_numbers = #tpu.dot_dimension_numbers<[1], [1], [0], [0], [0, 0, 1, 0], [], []>} : vector<8x32xf32>, vector<32x32xf32>, vector<8x32xf32> -> vector<8x32xf32>
    %67 = arith.subf %65, %66 : vector<8x32xf32>
    %cst_27 = arith.constant dense<0.000000e+00> : vector<8x32xf32>
    %68 = tpu.matmul %43, %64, %cst_27 {dimension_numbers = #tpu.dot_dimension_numbers<[1], [1], [0], [0], [0, 0, 1, 0], [], []>} : vector<8x32xf32>, vector<32x32xf32>, vector<8x32xf32> -> vector<8x32xf32>
    %cst_28 = arith.constant dense<0.000000e+00> : vector<8x32xf32>
    %69 = tpu.matmul %44, %55, %cst_28 {dimension_numbers = #tpu.dot_dimension_numbers<[1], [1], [0], [0], [0, 0, 1, 0], [], []>} : vector<8x32xf32>, vector<32x32xf32>, vector<8x32xf32> -> vector<8x32xf32>
    %70 = arith.addf %68, %69 : vector<8x32xf32>
    %cst_29 = arith.constant 2.000000e+00 : f32
    %71 = vector.broadcast %cst_29 : f32 to vector<8x32xf32>
    %72 = arith.mulf %71, %67 : vector<8x32xf32>
    %cst_30 = arith.constant -3.000000e+01 : f32
    %cst_31 = arith.constant 3.000000e+01 : f32
    %73 = vector.broadcast %cst_30 : f32 to vector<8x32xf32>
    %74 = arith.maximumf %73, %72 : vector<8x32xf32>
    %75 = vector.broadcast %cst_31 : f32 to vector<8x32xf32>
    %76 = arith.minimumf %75, %74 : vector<8x32xf32>
    %cst_32 = arith.constant 2.000000e+00 : f32
    %77 = vector.broadcast %cst_32 : f32 to vector<8x32xf32>
    %78 = arith.mulf %77, %70 : vector<8x32xf32>
    %79 = math.exp %76 : vector<8x32xf32>
    %80 = tpu.reciprocal %79 {approx = true} : vector<8x32xf32> -> vector<8x32xf32>
    %81 = arith.addf %79, %80 : vector<8x32xf32>
    %cst_33 = arith.constant 5.000000e-01 : f32
    %82 = vector.broadcast %cst_33 : f32 to vector<8x32xf32>
    %83 = arith.mulf %82, %81 : vector<8x32xf32>
    %84 = math.cos %78 : vector<8x32xf32>
    %85 = arith.addf %83, %84 : vector<8x32xf32>
    %cst_34 = arith.constant 1.000000e+00 : f32
    %86 = vector.broadcast %cst_34 : f32 to vector<8x32xf32>
    %87 = arith.divf %86, %85 : vector<8x32xf32>
    %88 = arith.subf %79, %80 : vector<8x32xf32>
    %cst_35 = arith.constant 5.000000e-01 : f32
    %89 = vector.broadcast %cst_35 : f32 to vector<8x32xf32>
    %90 = arith.mulf %89, %88 : vector<8x32xf32>
    %91 = arith.mulf %90, %87 : vector<8x32xf32>
    %92 = math.sin %78 : vector<8x32xf32>
    %93 = arith.mulf %92, %87 : vector<8x32xf32>
    %cst_36 = arith.constant dense<0.000000e+00> : vector<8x32xf32>
    %94 = tpu.matmul %91, %55, %cst_36 {dimension_numbers = #tpu.dot_dimension_numbers<[1], [0], [0], [1], [0, 0, 1, 1], [], []>} : vector<8x32xf32>, vector<32x32xf32>, vector<8x32xf32> -> vector<8x32xf32>
    %cst_37 = arith.constant dense<0.000000e+00> : vector<8x32xf32>
    %95 = tpu.matmul %93, %64, %cst_37 {dimension_numbers = #tpu.dot_dimension_numbers<[1], [0], [0], [1], [0, 0, 1, 1], [], []>} : vector<8x32xf32>, vector<32x32xf32>, vector<8x32xf32> -> vector<8x32xf32>
    %96 = arith.subf %94, %95 : vector<8x32xf32>
    %cst_38 = arith.constant dense<0.000000e+00> : vector<8x32xf32>
    %97 = tpu.matmul %91, %64, %cst_38 {dimension_numbers = #tpu.dot_dimension_numbers<[1], [0], [0], [1], [0, 0, 1, 1], [], []>} : vector<8x32xf32>, vector<32x32xf32>, vector<8x32xf32> -> vector<8x32xf32>
    %cst_39 = arith.constant dense<0.000000e+00> : vector<8x32xf32>
    %98 = tpu.matmul %93, %55, %cst_39 {dimension_numbers = #tpu.dot_dimension_numbers<[1], [0], [0], [1], [0, 0, 1, 1], [], []>} : vector<8x32xf32>, vector<32x32xf32>, vector<8x32xf32> -> vector<8x32xf32>
    %99 = arith.addf %97, %98 : vector<8x32xf32>
    %cst_40 = arith.constant dense<0.000000e+00> : vector<16x32xf32>
    %100 = tpu.matmul %4, %96, %cst_40 {dimension_numbers = #tpu.dot_dimension_numbers<[1], [0], [0], [1], [0, 0, 1, 1], [], []>} : vector<16x8xf32>, vector<8x32xf32>, vector<16x32xf32> -> vector<16x32xf32>
    %cst_41 = arith.constant dense<0.000000e+00> : vector<16x32xf32>
    %101 = tpu.matmul %5, %99, %cst_41 {dimension_numbers = #tpu.dot_dimension_numbers<[1], [0], [0], [1], [0, 0, 1, 1], [], []>} : vector<16x8xf32>, vector<8x32xf32>, vector<16x32xf32> -> vector<16x32xf32>
    %102 = arith.addf %100, %101 : vector<16x32xf32>
    %103 = arith.truncf %102 : vector<16x32xf32> to vector<16x32xbf16>
    %c0_42 = arith.constant 0 : index
    %c0_43 = arith.constant 0 : index
    %c0_44 = arith.constant 0 : index
    %104 = vector.load %arg9[%c0_42, %c0_43, %c0_44] : memref<1x16x32xbf16, #tpu.memory_space<vmem>>, vector<1x16x32xbf16>
    %105 = vector.shape_cast %104 : vector<1x16x32xbf16> to vector<16x32xbf16>
    %106 = vector.shape_cast %103 : vector<16x32xbf16> to vector<1x16x32xbf16>
    tpu.vector_store %arg9[%c0_42, %c0_43, %c0_44], %106 {strides = array<i32>} : memref<1x16x32xbf16, #tpu.memory_space<vmem>>, vector<1x16x32xbf16>,
    return
  }
  func.func @transform_0(%arg0: i32) -> (i32, i32, i32) {
    %c0_i32 = arith.constant 0 : i32
    %c0_i32_0 = arith.constant 0 : i32
    %c0_i32_1 = arith.constant 0 : i32
    return %arg0, %c0_i32, %c0_i32_0 : i32, i32, i32
  }
  func.func @transform_1(%arg0: i32) -> (i32, i32, i32) {
    %c0_i32 = arith.constant 0 : i32
    %c0_i32_0 = arith.constant 0 : i32
    %c0_i32_1 = arith.constant 0 : i32
    return %arg0, %c0_i32, %c0_i32_0 : i32, i32, i32
  }
  func.func @transform_2(%arg0: i32) -> (i32, i32) {
    %c0_i32 = arith.constant 0 : i32
    %c0_i32_0 = arith.constant 0 : i32
    %c0_i32_1 = arith.constant 0 : i32
    return %c0_i32, %c0_i32_0 : i32, i32
  }
  func.func @transform_3(%arg0: i32) -> (i32, i32) {
    %c0_i32 = arith.constant 0 : i32
    %c0_i32_0 = arith.constant 0 : i32
    %c0_i32_1 = arith.constant 0 : i32
    return %c0_i32, %c0_i32_0 : i32, i32
  }
  func.func @transform_4(%arg0: i32) -> (i32, i32) {
    %c0_i32 = arith.constant 0 : i32
    %c0_i32_0 = arith.constant 0 : i32
    %c0_i32_1 = arith.constant 0 : i32
    return %c0_i32, %c0_i32_0 : i32, i32
  }
  func.func @transform_5(%arg0: i32) -> (i32, i32) {
    %c0_i32 = arith.constant 0 : i32
    %c0_i32_0 = arith.constant 0 : i32
    %c0_i32_1 = arith.constant 0 : i32
    return %c0_i32, %c0_i32_0 : i32, i32
  }
  func.func @transform_6(%arg0: i32) -> (i32, i32) {
    %c0_i32 = arith.constant 0 : i32
    %c0_i32_0 = arith.constant 0 : i32
    %c0_i32_1 = arith.constant 0 : i32
    return %c0_i32, %c0_i32_0 : i32, i32
  }
  func.func @transform_7(%arg0: i32) -> (i32, i32) {
    %c0_i32 = arith.constant 0 : i32
    %c0_i32_0 = arith.constant 0 : i32
    %c0_i32_1 = arith.constant 0 : i32
    return %c0_i32, %c0_i32_0 : i32, i32
  }
  func.func @transform_8(%arg0: i32) -> (i32, i32, i32) {
    %c0_i32 = arith.constant 0 : i32
    %c0_i32_0 = arith.constant 0 : i32
    %c0_i32_1 = arith.constant 0 : i32
    return %arg0, %c0_i32, %c0_i32_0 : i32, i32, i32
  }
}

</mosaic_0001>

<bundles_post_ra>
// kernel: spectral_cross_1d.1
= control target key start
LH: loop header
LB: loop body
LE: loop exit
PB: predicated region body
PF: predicated region fallthrough
CT: control target
= control target key end

     0   :  { %s2144_s27 = smov 0   ;;  %s2332_s0 = inlined_call_operand.vmem [shape: f32[2,16,32], index: 0, kind: input, shape index: {}]   ;;  %s2333_s1 = inlined_call_operand.vmem [shape: f32[2,16,32], index: 1, kind: input, shape index: {}]   ;;  %s2334_s2 = inlined_call_operand.vmem [shape: f32[8,16], index: 2, kind: input, shape index: {}, may-alias: {2,4}]   ;;  %s2335_s3 = inlined_call_operand.vmem [shape: f32[8,16], index: 3, kind: input, shape index: {}, may-alias: {3,5}]   ;;  %s2336_s4 = inlined_call_operand.vmem [shape: f32[8,16], index: 4, kind: input, shape index: {}, may-alias: {2,4}]   ;;  %s2337_s5 = inlined_call_operand.vmem [shape: f32[8,16], index: 5, kind: input, shape index: {}, may-alias: {3,5}]   ;;  %s2338_s6 = inlined_call_operand.vmem [shape: f32[16,8], index: 6, kind: input, shape index: {}]   ;;  %s2339_s7 = inlined_call_operand.vmem [shape: f32[16,8], index: 7, kind: input, shape index: {}]   ;;  %s2340_s8 = inlined_call_operand.vmem [shape: bf16[2,16,32], index: 8, kind: output, shape index: {}]  }
   0x1 LB: > { %s1728_s28 = sadd.s32 4294967295, %s2088_s27   ;;  %p1732_p0 = scmp.ge.s32.totalorder %s2088_s27, 1  ;;  %s2088_s27 = sphi %s2144_s27, %s18_s27  }
   0x2   : > { %p272_p1 = scmp.lt.s32.totalorder %s2088_s27, 3 }
   0x4   : > { %p273_p2 = pnand %p1732_p0, %p272_p1 }
   0x5   : > { %p311_p3 = scmp.lt.s32.totalorder (!%p273_p2), %s1728_s28, 1  ;;  %v2090_v0 = vmov (!%p273_p2), 0.0|0.0   ;;  %vm2091_vm0 = vmmov (!%p273_p2), 0   ;;  %v2092_v1 = vmov (!%p273_p2), 0.0   ;;  %v326_v8 = vld [vmem:[%s2334_s2] sm:$0xff] (!%p273_p2)  ;;  %vm364_vm1 = vcmask (!%p273_p2), 130048  }
   0x6   : > { %276 = sbr.rel (%p273_p2) target bundleno = 1056 (0x420), region = 52  ;;  %1977 = vmatprep.subr.bf16.mxu1 (!%p273_p2), %v2090_v0  ;;  %1983 = vmatprep.subr.bf16.mxu0 (!%p273_p2), %v2090_v0  ;;  %v328_v9 = vld [vmem:[%s2336_s4] sm:$0xff] (!%p273_p2)  ;;  %v334_v12 = vlaneseq (!%p273_p2)  ;;  %vm665_vm4 = vcmask (!%p273_p2), 261120   ;;  %v2093_v58 = vmov (!%p273_p2), 683565275  }
   0x7   : > { %1855 = vmatprep.mubr.msk.f32.mxu1 (!%p273_p2), %vm2091_vm0, %v2092_v1  ;;  %1869 = vmatprep.mubr.msk.f32.mxu0 (!%p273_p2), %vm2091_vm0, %v2092_v1  ;;  %v327_v10 = vld [vmem:[%s2335_s3] sm:$0xff] (!%p273_p2)  ;;  %vm2199_vm7 = vmpackc.low (!%p273_p2), %vm665_vm4, %vm665_vm4  ;;  %v2094_v60 = vmov (!%p273_p2), 2475754826   ;;  %v2095_v63 = vmov (!%p273_p2), 2131351028  }
   0x8   : > { %v329_v11 = vld [vmem:[%s2337_s5] sm:$0xff] (!%p273_p2)  ;;  %v335_v13 = vand.u32 (!%p273_p2), 127, %v334_v12 }
   0xa   : > { %v340_v14 = vand.u32 (!%p273_p2), 3, %v335_v13 }
   0xc   : > { %vm348_vm2 = vcmp.eq.s32.totalorder (!%p273_p2), %v340_v14, 0  ;;  %vm351_vm3 = vcmp.eq.s32.totalorder (!%p273_p2), %v340_v14, 1  ;;  %vm354_vm5 = vcmp.eq.s32.totalorder (!%p273_p2), %v340_v14, 2  ;;  %vm357_vm6 = vcmp.eq.s32.totalorder (!%p273_p2), %v340_v14, 3 }
   0xd   : > { %s2344_s28 = smov (!%p311_p3, %s1728_s28), 1  ;;  %v1739_v15 = vsel %vm348_vm2, 1.0, %v2092_v1  ;;  %v1740_v16 = vsel %vm351_vm3, 1.0, %v2092_v1  ;;  %v1741_v26 = vsel %vm354_vm5, 1.0, %v2092_v1  ;;  %v1742_v27 = vsel %vm357_vm6, 1.0, %v2092_v1 }
   0xe   : > { %s1788_s29 = sshll.u32 %s2344_s28, 4 }
   0xf   : > { %s315_s10 = scalar_lea.vmem %s2332_s0, %s1788_s29  ;;  %s320_s13 = scalar_lea.vmem %s2333_s1, %s1788_s29 }
  0x10   : > { %v360_v2 = vld [vmem:[%s315_s10] sm:$0xff]  ;;  %v361_v3 = vld [vmem:[%s315_s10 + $0x8] sm:$0xff]  ;;  %s1790_s10 = sshll.u32 %s2344_s28, 3 }
  0x11   : > { %v362_v4 = vld [vmem:[%s320_s13] sm:$0xff]  ;;  %v1978_v5 = vpack.c.bf16 %v361_v3, %v360_v2  ;;  %v363_v6 = vld [vmem:[%s320_s13 + $0x8] sm:$0xff]  ;;  %s325_s13 = scalar_lea.vmem %s2340_s8, %s1790_s10 }
  0x12   : > { %v1984_v7 = vpack.c.bf16 %v363_v6, %v362_v4  ;;  %v2096_v4 = vmov 2102212464  }
  0x13   : > { %1979 = vmatpush3.bf16.msra.mxu1 %v1978_v5 }
  0x14   : > { %1985 = vmatpush3.bf16.msra.mxu0 %v1984_v7  ;;  %1980 = vmatprep.subr.bf16.mxu1 %v2090_v0 }
  0x15   : > { %1989 = vmatprep.subr.bf16.mxu0 %v2090_v0 }
  0x16   : > { %1856 = vmatmul.mubr.msk.f32.vlgmr.msra.gmra.mrb[0].mxu1 %vm364_vm1, %v326_v8 }
  0x17   : > { %1870 = vmatmul.mubr.msk.f32.vlgmr.msra.gmra.mrb[0].mxu0 %vm364_vm1, %v328_v9  ;;  %1982 = vmatpush3.bf16.msra.mxu1 %v1978_v5 }
  0x18   : > { %1862 = vmatprep.mubr.msk.f32.mxu1 %vm2091_vm0, %v2092_v1  ;;  %1986 = vmatprep.subr.bf16.mxu1 %v2090_v0 }
  0x19   : > { %1887 = vmatprep.mubr.msk.f32.mxu0 %vm2091_vm0, %v2092_v1 }
  0x1a   : > { %1863 = vmatmul.mubr.msk.f32.vlgmr.msra.gmra.mrb[2].mxu1 %vm364_vm1, %v327_v10  ;;  %v2098_v10 = vmov 1326507024  }
  0x1b   : > { %1988 = vmatpush3.bf16.msra.mxu1 %v1984_v7  ;;  %1876 = vmatprep.mubr.msk.f32.mxu1 %vm2091_vm0, %v2092_v1  ;;  %v2097_v7 = vmov 920167782  }
  0x1c   : > { %1997 = vmatprep.subr.bf16.mxu1 %v2090_v0 }
  0x1e   : > { %1877 = vmatmul.mubr.msk.f32.vlgmr.msra.gmra.mrb[4].mxu1 %vm364_vm1, %v329_v11 }
  0x1f   : > { %1898 = vmatprep.mubr.msk.f32.mxu1 %vm2091_vm0, %v2092_v1 }
  0xe9   : > { %v434_v17 = vpop.f32.mrb[0].mxu1 }
  0xea   : > { %v580_v18 = vpop.f32.mrb[0].mxu0  ;;  %v1857_v19 = vpop.f32.mrb[1].mxu1 }
  0xeb   : > { %v657_v20 = vmul.f32 %v1739_v15, %v580_v18  ;;  %v658_v21 = vmul.f32 %v1740_v16, %v580_v18  ;;  %v1871_v22 = vpop.f32.mrb[1].mxu0  ;;  %v659_v29 = vmul.f32 %v1741_v26, %v580_v18  ;;  %v660_v30 = vmul.f32 %v1742_v27, %v580_v18 }
  0xed   : > { %v2203_v24 = vpack.c.bf16 %v658_v21, %v657_v20  ;;  %v507_v25 = vpop.f32.mrb[2].mxu1  ;;  %v2213_v36 = vpack.c.bf16 %v660_v30, %v659_v29 }
  0xee   : > { %v1864_v28 = vpop.f32.mrb[3].mxu1 }
  0xef   : > { %1992 = vmatpush3.bf16.xpose.msk.msra.mxu0 %vm2199_vm7, %v2203_v24 }
  0xf0   : > { %1993 = vmatprep.subr.bf16.mxu0 %v2090_v0 }
  0xf1   : > { %v653_v31 = vpop.f32.mrb[4].mxu1 }
  0xf2   : > { %v661_v32 = vmul.f32 %v1739_v15, %v653_v31  ;;  %v662_v33 = vmul.f32 %v1740_v16, %v653_v31  ;;  %v1878_v34 = vpop.f32.mrb[5].mxu1  ;;  %v663_v37 = vmul.f32 %v1741_v26, %v653_v31  ;;  %v664_v38 = vmul.f32 %v1742_v27, %v653_v31 }
  0xf4   : > { %v2211_v35 = vpack.c.bf16 %v662_v33, %v661_v32  ;;  %v2223_v39 = vpack.c.bf16 %v664_v38, %v663_v37 }
  0xf6   : > { %2000 = vmatpush3.bf16.xpose.msk.msra.mxu1 %vm2199_vm7, %v2211_v35 }
  0xf7   : > { %1996 = vmatpush3.bf16.xpose.msk.msra.mxu0 %vm2199_vm7, %v2213_v36  ;;  %2001 = vmatprep.subr.bf16.mxu1 %v2090_v0 }
  0xf8   : > { %2005 = vmatprep.subr.bf16.mxu0 %v2090_v0 }
  0xfe   : > { %1888 = vmatmul.mubr.msk.f32.vlgmr.msra.gmra.mrb[2].mxu0 %vm665_vm4, %v434_v17  ;;  %2004 = vmatpush3.bf16.xpose.msk.msra.mxu1 %vm2199_vm7, %v2223_v39 }
  0xff   : > { %2008 = vmatpush3.bf16.xpose.msk.msra.mxu0 %vm2199_vm7, %v2203_v24  ;;  %2021 = vmatprep.subr.bf16.mxu1 %v2090_v0 }
 0x100   : > { %2009 = vmatprep.subr.bf16.mxu0 %v2090_v0  ;;  %1909 = vmatprep.mubr.msk.f32.mxu0 %vm2091_vm0, %v2092_v1 }
 0x105   : > { %1899 = vmatmul.mubr.msk.f32.vlgmr.msra.gmra.mrb[6].mxu1 %vm665_vm4, %v507_v25 }
 0x106   : > { %2023 = vmatpush3.bf16.msra.mxu1 %v2203_v24  ;;  %1931 = vmatprep.mubr.msk.f32.mxu1 %vm2091_vm0, %v2092_v1 }
 0x107   : > { %2012 = vmatpush3.bf16.xpose.msk.msra.mxu0 %vm2199_vm7, %v2213_v36  ;;  %2024 = vmatprep.subr.bf16.mxu1 %v2090_v0 }
 0x108   : > { %2013 = vmatprep.subr.bf16.mxu0 %v2090_v0 }
 0x10a   : > { %2026 = vmatpush3.bf16.msra.mxu1 %v2213_v36 }
 0x10b   : > { %2027 = vmatprep.subr.bf16.mxu1 %v2090_v0 }
 0x10e   : > { %1910 = vmatmul.mubr.msk.f32.vlgmr.msra.gmra.mrb[4].mxu0 %vm665_vm4, %v507_v25 }
 0x10f   : > { %2016 = vmatpush3.bf16.xpose.msk.msra.mxu0 %vm2199_vm7, %v2211_v35  ;;  %1920 = vmatprep.mubr.msk.f32.mxu0 %vm2091_vm0, %v2092_v1 }
 0x110   : > { %2017 = vmatprep.subr.bf16.mxu0 %v2090_v0 }
 0x117   : > { %2020 = vmatpush3.bf16.xpose.msk.msra.mxu0 %vm2199_vm7, %v2223_v39 }
 0x11e   : > { %1921 = vmatmul.mubr.msk.f32.vlgmr.msra.gmra.mrb[4].mxu0 %vm665_vm4, %v434_v17 }
 0x1d1   : > { %v2258_v40 = vpop.f32.mrb[2].mxu0 }
 0x1d2   : > { %v1889_v41 = vpop.f32.mrb[3].mxu0 }
 0x1d8   : > { %v2260_v42 = vpop.f32.mrb[6].mxu1 }
 0x1d9   : > { %v836_v43 = vsub.f32 %v2258_v40, %v2260_v42  ;;  %v1900_v44 = vpop.f32.mrb[7].mxu1 }
 0x1f1   : > { %v973_v45 = vpop.f32.mrb[4].mxu0 }
 0x1f2   : > { %v2264_v46 = vmul.f32 2.0, %v973_v45  ;;  %v1922_v47 = vpop.f32.mrb[5].mxu0 }
 0x1f4   : > { %v989_v48 = vand.u32 2139095040, %v2264_v46  ;;  %v986_v52 = vand.u32 2147483647, %v2264_v46  ;;  %vm988_vm15 = vcmp.lt.s32.totalorder %v2264_v46, 0 }
 0x1f6   : > { %v990_v49 = vshrl.u32 %v989_v48, 23  ;;  %v993_v55 = vand.u32 8388607, %v986_v52  ;;  %vm987_vm1 = vcmp.le.f32.partialorder %v986_v52, 0.7853982 }
 0x1f8   : > { %v1768_v50 = vadd.s32 4294967169, %v990_v49  ;;  %v994_v12 = vor.u32 8388608, %v993_v55 }
 0x1fa   : > { %v996_v51 = vadd.s32 1, %v1768_v50  ;;  %v1034_v27 = vshll.u32 %v994_v12, 8 }
 0x1fc   : > { %vm997_vm8 = vcmp.gt.s32.totalorder %v996_v51, 0 }
 0x1fd   : > { %v998_v53 = vsel %vm997_vm8, %v996_v51, 0 }
 0x1fe   : > { %v1000_v54 = vand.u32 31, %v998_v53  ;;  %v999_v57 = vshrl.u32 %v998_v53, 5  ;;  %v977_v53 = vmul.f32 2.0, %v836_v43 }
 0x200   : > { %v1001_v56 = vsub.s32 32, %v1000_v54  ;;  %v1003_v59 = vshll.u32 %v2093_v58, %v1000_v54  ;;  %v1006_v61 = vshll.u32 %v2094_v60, %v1000_v54  ;;  %v1009_v3 = vshll.u32 %v2095_v63, %v1000_v54 }
 0x201   : > { %v1012_v6 = vshll.u32 %v2096_v4, %v1000_v54  ;;  %v1015_v9 = vshll.u32 %v2097_v7, %v1000_v54  ;;  %vm1018_vm9 = vcmp.lt.s32.totalorder %v999_v57, 1  ;;  %vm1021_vm10 = vcmp.lt.s32.totalorder %v999_v57, 4 }
 0x202   : > { %v1004_v62 = vshrl.u32 %v2094_v60, %v1001_v56  ;;  %v1007_v2 = vshrl.u32 %v2095_v63, %v1001_v56  ;;  %v1010_v5 = vshrl.u32 %v2096_v4, %v1001_v56  ;;  %v1013_v8 = vshrl.u32 %v2097_v7, %v1001_v56 }
 0x203   : > { %v1016_v11 = vshrl.u32 %v2098_v10, %v1001_v56  ;;  %v1002_v21 = vshrl.u32 %v2093_v58, %v1001_v56  ;;  %vm1020_vm11 = vcmp.lt.s32.totalorder %v999_v57, 3  ;;  %vm1019_vm12 = vcmp.lt.s32.totalorder %v999_v57, 2 }
 0x204   : > { %v1005_v13 = vor.u32 %v1004_v62, %v1003_v59  ;;  %v1008_v14 = vor.u32 %v1007_v2, %v1006_v61  ;;  %v1011_v15 = vor.u32 %v1010_v5, %v1009_v3  ;;  %v1014_v16 = vor.u32 %v1013_v8, %v1012_v6 }
 0x205   : > { %v1017_v17 = vor.u32 %v1016_v11, %v1015_v9  ;;  %v1767_v56 = vclamps-f32 %v977_v53, 30.0 }
 0x206   : > { %v1023_v18 = vsel %vm1021_vm10, %v1011_v15, 2102212464  ;;  %v1026_v19 = vsel %vm1018_vm9, %v1005_v13, %v1008_v14  ;;  %v1030_v20 = vsel %vm1018_vm9, %v1008_v14, %v1011_v15  ;;  %v1027_v22 = vsel %vm1021_vm10, %v1014_v16, 920167782 }
 0x207   : > { %v1031_v23 = vsel %vm1021_vm10, %v1017_v17, 1326507024  ;;  %v1028_v25 = vsel %vm1020_vm11, %v1011_v15, %v1027_v22  ;;  %v1022_v28 = vsel %vm1018_vm9, %v1002_v21, %v1005_v13  ;;  %v1024_v29 = vsel %vm1020_vm11, %v1008_v14, %v1023_v18 }
 0x208   : > { %v1032_v26 = vsel %vm1020_vm11, %v1014_v16, %v1031_v23  ;;  %v1029_v30 = vsel %vm1019_vm12, %v1026_v19, %v1028_v25  ;;  %v1025_v38 = vsel %vm1019_vm12, %v1022_v28, %v1024_v29  ;;  %v981_v59 = vmul.f32 1.442695, %v1767_v56 }
 0x209   : > { %v1033_v31 = vsel %vm1019_vm12, %v1030_v20, %v1032_v26  ;;  %v2273_v34 = vmul.u32.u64.low %v1034_v27, %v1029_v30  ;;  %v2274_v37 = vmul.u32.u64.high %v1034_v27, %v1029_v30, %v2273_v34  ;;  %v1041_v44 = vmul.u32 %v1034_v27, %v1025_v38 }
 0x20a   : > { %v2270_v32 = vmul.u32.u64.low %v1034_v27, %v1033_v31  ;;  %v2271_v33 = vmul.u32.u64.high %v1034_v27, %v1033_v31, %v2270_v32  ;;  %2072 = vpow2.f32 %v981_v59  ;;  %vm1078_vm9 = vweird.f32 %v2264_v46 }
 0x20b   : > { %v1044_v41 = vadd.s32 1, %v2274_v37  ;;  %vm1487_vm10 = vcmask 64512  }
 0x20c   : > { %vm1043_vm13 = vc.u32 %v2271_v33, %v2273_v34  ;;  %v1042_v61 = vadd.s32 %v2273_v34, %v2271_v33 }
 0x20d   : > { %v1045_v45 = vsel %vm1043_vm13, %v1044_v41, %v2274_v37 }
 0x20e   : > { %v1046_v47 = vadd.s32 %v1045_v45, %v1041_v44 }
 0x210   : > { %v1047_v48 = vadd.s32 536870912, %v1046_v47 }
 0x212   : > { %v1048_v49 = vshrl.u32 %v1047_v48, 30  ;;  %v330_v48 = vld [vmem:[%s2338_s6] sm:$0xff] }
 0x214   : > { %v1049_v50 = vshll.u32 %v1048_v49, 30  ;;  %v1072_v8 = vsub.s32 4, %v1048_v49  ;;  %v2073_v9 = vpop.eup %2072 }
 0x215   : > { %2074 = vrcp.f32 %v2073_v9 }
 0x216   : > { %v1050_v51 = vsub.s32 %v1046_v47, %v1049_v50  ;;  %v1073_v12 = vsel %vm988_vm15, %v1072_v8, %v1048_v49  ;;  %v331_v49 = vld [vmem:[%s2338_s6 + $0x8] sm:$0xff] }
 0x217   : > { %v1075_v14 = vsel %vm987_vm1, 0, %v1073_v12 }
 0x218   : > { %v1052_v54 = vsub.s32 0, %v1050_v51  ;;  %v1188_v15 = vadd.s32 3, %v1075_v14  ;;  %v1079_v17 = vand.u32 3, %v1075_v14 }
 0x21a   : > { %v1769_v55 = vmin.u32 %v1052_v54, %v1050_v51  ;;  %v1189_v18 = vand.u32 3, %v1188_v15  ;;  %vm1084_vm2 = vcmp.eq.s32.totalorder %v1079_v17, 2  ;;  %vm1081_vm5 = vcmp.eq.s32.totalorder %v1079_v17, 0 }
 0x21b   : > { %vm1080_vm7 = vcmp.lt.s32.totalorder %v1079_v17, 2 }
 0x21c   : > { %v1054_v57 = vclz %v1769_v55  ;;  %vm1194_vm3 = vcmp.eq.s32.totalorder %v1189_v18, 2  ;;  %vm1191_vm6 = vcmp.eq.s32.totalorder %v1189_v18, 0  ;;  %vm1190_vm8 = vcmp.lt.s32.totalorder %v1189_v18, 2 }
 0x21e   : > { %v1770_v58 = vadd.s32 4294967294, %v1054_v57 }
 0x21f   : > { %v2075_v16 = vpop.eup %2074 }
 0x220   : > { %vm1771_vm14 = vcmp.lt.s32.totalorder %v1770_v58, 0  ;;  %v984_v21 = vadd.f32 %v2075_v16, %v2073_v9  ;;  %v1092_v34 = vsub.f32 %v2073_v9, %v2075_v16 }
 0x221   : > { %v1057_v60 = vsel %vm1771_vm14, 0, %v1770_v58 }
 0x222   : > { %v1058_v62 = vsub.s32 32, %v1057_v60  ;;  %v1062_v63 = vsub.s32 4294967266, %v1057_v60  ;;  %v1059_v2 = vshll.u32 %v1050_v51, %v1057_v60  ;;  %v985_v28 = vmul.f32 0.5, %v984_v21 }
 0x223   : > { %v1093_v37 = vmul.f32 0.5, %v1092_v34 }
 0x224   : > { %v1060_v3 = vshrl.u32 %v1042_v61, %v1058_v62  ;;  %v1063_v4 = vadd.s32 127, %v1062_v63 }
 0x226   : > { %v1061_v5 = vor.u32 %v1060_v3, %v1059_v2  ;;  %v1064_v6 = vshll.u32 %v1063_v4, 23 }
 0x228   : > { %v1065_v40 = vor.u32 4788187, %v1064_v6  ;;  %v1068_v43 = vcvt.s32.f32 %v1061_v5 }
 0x22a   : > { %v1066_v42 = vand.u32 2147483647, %v1065_v40 }
 0x22c   : > { %v1069_v7 = vmul.f32 %v1068_v43, %v1066_v42 }
 0x22e   : > { %v1070_v10 = vxor.u32 2147483648, %v1069_v7 }
 0x230   : > { %v1071_v11 = vsel %vm988_vm15, %v1070_v10, %v1069_v7 }
 0x231   : > { %v1074_v13 = vsel %vm987_vm1, %v2264_v46, %v1071_v11 }
 0x232   : > { %2076 = vcosq.f32 %v1074_v13 }
 0x233   : > { %2078 = vsinq.f32 %v1074_v13 }
 0x23c   : > { %v2077_v19 = vpop.eup %2076 }
 0x23d   : > { %v2079_v20 = vpop.eup %2078  ;;  %v1085_v22 = vxor.u32 2147483648, %v2077_v19 }
 0x23e   : > { %v1082_v23 = vxor.u32 2147483648, %v2079_v20 }
 0x23f   : > { %v1086_v52 = vsel %vm1084_vm2, %v1085_v22, %v2079_v20  ;;  %v1196_v25 = vsel %vm1194_vm3, %v1085_v22, %v2079_v20 }
 0x240   : > { %v1083_v26 = vsel %vm1081_vm5, %v2077_v19, %v1082_v23  ;;  %v1193_v27 = vsel %vm1191_vm6, %v2077_v19, %v1082_v23 }
 0x241   : > { %v1087_v29 = vsel %vm1080_vm7, %v1083_v26, %v1086_v52  ;;  %v1197_v30 = vsel %vm1190_vm8, %v1193_v27, %v1196_v25 }
 0x242   : > { %v1088_v31 = vsel %vm1078_vm9, nan, %v1087_v29  ;;  %v1198_v32 = vsel %vm1078_vm9, nan, %v1197_v30 }
 0x243   : > { %v1089_v33 = vadd.f32 %v1088_v31, %v985_v28 }
 0x245   : > { %2080 = vrcp.f32 %v1089_v33 }
 0x24f   : > { %v2081_v38 = vpop.eup %2080 }
 0x250   : > { %v1094_v41 = vmul.f32 %v2081_v38, %v1093_v37  ;;  %v1199_v44 = vmul.f32 %v2081_v38, %v1198_v32 }
 0x252   : > { %1932 = vmatmul.mubr.msk.f32.vlgmr.msra.gmra.mrb[8].mxu1 %vm665_vm4, %v1094_v41 }
 0x253   : > { %2029 = vmatpush3.bf16.msra.mxu1 %v2211_v35  ;;  %1942 = vmatprep.mubr.msk.f32.mxu1 %vm2091_vm0, %v2092_v1 }
 0x254   : > { %2030 = vmatprep.subr.bf16.mxu1 %v2090_v0 }
 0x257   : > { %2032 = vmatpush3.bf16.msra.mxu1 %v2223_v39 }
 0x258   : > { %2033 = vmatprep.subr.bf16.mxu1 %v2090_v0 }
 0x25a   : > { %1943 = vmatmul.mubr.msk.f32.vlgmr.msra.gmra.mrb[10].mxu1 %vm665_vm4, %v1199_v44 }
 0x25b   : > { %2035 = vmatpush3.bf16.msra.mxu1 %v2203_v24  ;;  %1953 = vmatprep.mubr.msk.f32.mxu1 %vm2091_vm0, %v2092_v1  ;;  %v332_v24 = vld [vmem:[%s2339_s7] sm:$0xff] }
 0x25c   : > { %2036 = vmatprep.subr.bf16.mxu1 %v2090_v0  ;;  %1969 = vmatprep.mubr.msk.f32.mxu0 %vm1487_vm10, %v332_v24 }
 0x25f   : > { %2038 = vmatpush3.bf16.msra.mxu1 %v2213_v36 }
 0x260   : > { %2039 = vmatprep.subr.bf16.mxu1 %v2090_v0 }
 0x262   : > { %1954 = vmatmul.mubr.msk.f32.vlgmr.msra.gmra.mrb[12].mxu1 %vm665_vm4, %v1199_v44 }
 0x263   : > { %2041 = vmatpush3.bf16.msra.mxu1 %v2211_v35  ;;  %1964 = vmatprep.mubr.msk.f32.mxu1 %vm2091_vm0, %v2092_v1  ;;  %vm1658_vm0 = vcmask 257024  }
 0x264   : > { %2042 = vmatprep.subr.bf16.mxu1 %v2090_v0  ;;  %v333_v0 = vld [vmem:[%s2339_s7 + $0x8] sm:$0xff] }
 0x267   : > { %2044 = vmatpush3.bf16.msra.mxu1 %v2223_v39 }
 0x26a   : > { %1965 = vmatmul.mubr.msk.f32.vlgmr.msra.gmra.mrb[12].mxu1 %vm665_vm4, %v1094_v41 }
 0x325   : > { %v1269_v36 = vpop.f32.mrb[8].mxu1 }
 0x326   : > { %v1933_v46 = vpop.f32.mrb[9].mxu1 }
 0x32d   : > { %v1342_v35 = vpop.f32.mrb[10].mxu1 }
 0x32e   : > { %v1346_v45 = vsub.f32 %v1269_v36, %v1342_v35  ;;  %v1944_v47 = vpop.f32.mrb[11].mxu1 }
 0x33d   : > { %v1483_v1 = vpop.f32.mrb[12].mxu1 }
 0x33e   : > { %v1966_v39 = vpop.f32.mrb[13].mxu1  ;;  %1967 = vmatprep.subr.mxu0 %v1483_v1 }
 0x33f   : > { %1968 = vmatpush3.msra.mxu0 %v1483_v1 }
 0x340   : > { %1970 = vmatmul.mubr.msk.f32.vlgmr.msra.gmra.mrb[6].mxu0 %vm1487_vm10, %v333_v0  ;;  %1972 = vmatprep.subr.mxu0 %v1346_v45 }
 0x341   : > { %1973 = vmatpush3.msra.mxu0 %v1346_v45  ;;  %1974 = vmatprep.mubr.msk.f32.mxu0 %vm1487_vm10, %v330_v48 }
 0x348   : > { %1975 = vmatmul.mubr.msk.f32.vlgmr.msra.gmra.mrb[6].mxu0 %vm1487_vm10, %v331_v49 }
 0x41b   : > { %v1976_v50 = vpop.f32.mrb[6].mxu0 }
 0x41c   : > { %v1792_v51 = vpack.c.bf16 %v1976_v50, %v1976_v50  ;;  %v1641_v53 = vpop.f32.mrb[7].mxu0 }
 0x41d   : > { %v1791_v54 = vpack.c.bf16 %v1641_v53, %v1641_v53 }
 0x41e   : > { %1660 = vst.msk [vmem:[%s325_s13 + $0x4] sm:$0xf] %vm1658_vm0, %v1792_v51 }
 0x41f   : > { %1659 = vst.msk [vmem:[%s325_s13] sm:$0xf] %vm1658_vm0, %v1791_v54 }
 0x420 PF: > { %s18_s27 = sadd.s32 1, %s2088_s27  }
 0x421   : > { %p15_p4 = scmp.ge.s32.totalorder %s18_s27, 4  }
 0x423   :  { %17 = sbr.rel (!%p15_p4) target bundleno = 1 (0x1), region = 85 }

</bundles_post_ra>
